<compile_context>
chip_gen: v7x
topology: tpu7x:2x2x1
jax: 0.10.0
libtpu: 0.0.40
codegen_flags: <defaults>
</compile_context>

<pallas_src>
import functools

import numpy as np
import jax
import jax.numpy as jnp
from jax import lax
from jax.experimental import pallas as pl
from jax.experimental.pallas import tpu as pltpu


def _make_kernel(T, K, dil, pad, Cin, Cout, Lt):
    """One grid step == one lane tile of Lt = (whole sequences) * T time steps."""
    t_is_pow2 = (T & (T - 1)) == 0
    shifts = [pad - k * dil for k in range(K)]   # left shift of tap k (>= 0, last is 0)

    def kernel(x_ref, w1_ref, b1_ref, wd_ref, bd_ref, w2_ref, b2_ref, o_ref):
        # Sequence phase of every lane, computed ONCE and shared by both convs.
        # Lane tiles always start at a sequence boundary and Lt % T == 0, so the
        # local lane index mod T is the time index within its own sequence.
        lane = lax.broadcasted_iota(jnp.int32, (1, Lt), 1)
        t_idx = (lane & (T - 1)) if t_is_pow2 else (lane % T)
        masks = {s: t_idx >= s for s in shifts if s > 0}

        xb = x_ref[...]                         # (Cin, Lt) bf16 (as stored in HBM)
        xf = xb.astype(jnp.float32)             # f32 copy for the shift/mask math

        def causal_conv(vf, vb, w_ref):
            # vf: (C, Lt) f32 (roll/mask math), vb: (C, Lt) bf16 (MXU operand for
            # the unshifted tap).  One tiny MXU matmul per tap -> no im2col
            # concatenate; every lane of every op is live.
            acc = None
            for k, s in enumerate(shifts):
                if s == 0:
                    tap = vb
                else:
                    # roll wraps within the tile; the wrapped lanes are exactly
                    # the lanes with t_idx < s, which the mask zeroes -> the
                    # per-sequence causal left padding AND the trailing chomp
                    # are realised in-register, in one select.
                    tap = jnp.where(masks[s],
                                    pltpu.roll(vf, shift=s, axis=1),
                                    0.0).astype(jnp.bfloat16)
                d = jnp.dot(w_ref[k], tap, preferred_element_type=jnp.float32)
                acc = d if acc is None else acc + d
            return acc

        # conv1 (+ folded BN1) -> chomp1 -> relu1   (dropout1 = identity)
        h1 = jnp.maximum(causal_conv(xf, xb, w1_ref) + b1_ref[...], 0.0)   # (Cout, Lt) f32
        # 1x1 downsample residual from the already-loaded x block
        res = jnp.dot(wd_ref[...], xb, preferred_element_type=jnp.float32) + bd_ref[...]
        # conv2 (+ folded BN2) -> chomp2 -> relu2   (dropout2 = identity)
        h2 = jnp.maximum(causal_conv(h1, h1.astype(jnp.bfloat16), w2_ref)
                         + b2_ref[...], 0.0)
        # residual add + final relu; the (Cout, Lt) store is fully lane-dense.
        o_ref[...] = jnp.maximum(h2 + res, 0.0)

    return kernel


def _pick_lane_tile(N, T, max_lanes):
    """Largest 128-aligned whole-sequence lane tile that fits; prefer >= 2 steps."""
    L = N * T
    cands = [bt * T for bt in range(N, 0, -1)
             if N % bt == 0 and (bt * T) % 128 == 0 and bt * T <= max_lanes]
    if not cands:
        # No aligned divisor-based tiling: a single block equal to the full
        # array is always legal (block dims == full array dims).
        # TODO(synk): pad N with dummy sequences for huge, awkward N*T so a
        # bounded tile always exists instead of one full-array block.
        return L
    lt = cands[0]
    if lt == L:
        # v7x: the 'parallel' grid axis only feeds both TensorCores with >= 2
        # steps; split when each piece still amortises per-step overhead.
        smaller = [c for c in cands if c <= L // 2 and c >= 2048]
        if smaller:
            lt = smaller[0]
    return lt


@functools.partial(
    jax.jit,
    static_argnames=("kernel_size", "dilation", "padding", "max_lanes_per_step"))
def temporal_block(x, params, *, kernel_size, dilation, padding,
                   max_lanes_per_step=32768):
    """TemporalBlock forward (eval mode). x: (N, Cin, T) f32 (PyTorch layout).

    Returns (N, Cout, T) f32.
    """
    N, Cin, T = x.shape
    K, dil, pad = kernel_size, dilation, padding
    Cout = params["w1"].shape[0]
    assert pad == (K - 1) * dil, "residual add requires causal-TCN padding"

    f32, bf16 = jnp.float32, jnp.bfloat16
    s1 = params["s1"].reshape(Cout).astype(f32)
    t1 = params["t1"].reshape(Cout).astype(f32)
    s2 = params["s2"].reshape(Cout).astype(f32)
    t2 = params["t2"].reshape(Cout).astype(f32)

    # ---- fold BatchNorm (inference) + conv bias into the conv weights ----
    # PyTorch Conv1d weight (Cout, Cin, K) -> per-tap (K, Cout, Cin) matmul LHS.
    w1f = jnp.transpose(params["w1"].astype(f32) * s1[:, None, None], (2, 0, 1)).astype(bf16)
    b1f = (params["b1"].reshape(Cout) * s1 + t1).reshape(Cout, 1)
    w2f = jnp.transpose(params["w2"].astype(f32) * s2[:, None, None], (2, 0, 1)).astype(bf16)
    b2f = (params["b2"].reshape(Cout) * s2 + t2).reshape(Cout, 1)
    wdf = params["wd"].reshape(Cout, Cin).astype(bf16)
    bdf = params["bd"].reshape(Cout, 1).astype(f32)

    # Time-on-lanes layout: (Cin, N*T) with sequences contiguous along lanes
    # (wrapper-side layout plumbing).  bf16 input halves HBM read traffic; all
    # accumulation stays f32 inside the kernel.
    x_lanes = jnp.transpose(x, (1, 0, 2)).reshape(Cin, N * T).astype(bf16)

    L = N * T
    Lt = _pick_lane_tile(N, T, max_lanes_per_step)
    n_steps = L // Lt

    kernel = _make_kernel(T, K, dil, pad, Cin, Cout, Lt)

    out = pl.pallas_call(
        kernel,
        out_shape=jax.ShapeDtypeStruct((Cout, L), f32),
        grid_spec=pltpu.PrefetchScalarGridSpec(
            num_scalar_prefetch=0,
            grid=(n_steps,),
            in_specs=[
                pl.BlockSpec((Cin, Lt), lambda i: (0, i)),          # x lane tile
                # Weight/bias index maps are constant -> fetched once, no
                # per-step re-DMA.
                pl.BlockSpec((K, Cout, Cin), lambda i: (0, 0, 0)),  # conv1 W (BN folded)
                pl.BlockSpec((Cout, 1), lambda i: (0, 0)),          # conv1 bias
                pl.BlockSpec((Cout, Cin), lambda i: (0, 0)),        # downsample W
                pl.BlockSpec((Cout, 1), lambda i: (0, 0)),          # downsample bias
                pl.BlockSpec((K, Cout, Cout), lambda i: (0, 0, 0)), # conv2 W (BN folded)
                pl.BlockSpec((Cout, 1), lambda i: (0, 0)),          # conv2 bias
            ],
            out_specs=pl.BlockSpec((Cout, Lt), lambda i: (0, i)),   # lane-dense store
        ),
        compiler_params=pltpu.CompilerParams(
            dimension_semantics=("parallel",),   # disjoint output lane tiles
            # <= v7x scoped default; per-tile live VMEM is far below this for
            # Lt <= 32K lanes (~a few hundred bytes per lane).
            vmem_limit_bytes=32 * 1024 * 1024,
        ),
    )(x_lanes, w1f, b1f, wdf, bdf, w2f, b2f)

    return out.reshape(Cout, N, T).transpose(1, 0, 2)


# ---------------- pure-numpy reference (same math, for verification) ----------------
def _np_conv1d(x, w, b, pad, dil):
    # x: (N, C, T), w: (Cout, C, K), b: (Cout,)
    N, C, T = x.shape
    Cout, _, K = w.shape
    xp = np.pad(x, ((0, 0), (0, 0), (pad, pad)))
    Tout = T + 2 * pad - dil * (K - 1)
    acc = np.zeros((N, Cout, Tout), np.float32)
    for k in range(K):
        acc += np.einsum("oc,nct->not", w[:, :, k], xp[:, :, k * dil:k * dil + Tout])
    return acc + b.reshape(1, Cout, 1)


def ref_forward(x, p, *, kernel_size, dilation, padding):
    x = np.asarray(x, np.float32)
    K, dil, pad = kernel_size, dilation, padding
    chomp = pad

    def bn(h, s, t):
        return h * s.reshape(1, -1, 1) + t.reshape(1, -1, 1)

    h = bn(_np_conv1d(x, p["w1"], p["b1"].ravel(), pad, dil), p["s1"], p["t1"])
    h = np.maximum(h[:, :, :h.shape[2] - chomp], 0.0)        # chomp1 + relu1
    h = bn(_np_conv1d(h, p["w2"], p["b2"].ravel(), pad, dil), p["s2"], p["t2"])
    h = np.maximum(h[:, :, :h.shape[2] - chomp], 0.0)        # chomp2 + relu2
    res = np.einsum("oc,nct->not", p["wd"], x) + p["bd"].reshape(1, -1, 1)
    return np.maximum(h + res, 0.0)


if __name__ == "__main__":
    N, T, Cin, Cout = 8, 16, 4, 8
    K, dil = 3, 1
    pad = (K - 1) * dil            # causal TCN padding
    eps = 1e-5

    key = jax.random.PRNGKey(0)
    ks = jax.random.split(key, 16)

    def bn_fold(g_key, b_key, m_key, v_key):
        gamma = 1.0 + 0.1 * jax.random.normal(g_key, (Cout,), jnp.float32)
        beta = 0.1 * jax.random.normal(b_key, (Cout,), jnp.float32)
        mean = 0.1 * jax.random.normal(m_key, (Cout,), jnp.float32)
        var = 1.0 + 0.1 * jnp.abs(jax.random.normal(v_key, (Cout,), jnp.float32))
        scale = gamma / jnp.sqrt(var + eps)
        shift = beta - mean * scale
        return scale, shift

    s1, t1 = bn_fold(ks[4], ks[5], ks[6], ks[7])
    s2, t2 = bn_fold(ks[8], ks[9], ks[10], ks[11])

    params = {
        # PyTorch-native Conv1d weight layout (C_out, C_in, K).
        "w1": 0.2 * jax.random.normal(ks[0], (Cout, Cin, K), jnp.float32),
        "b1": 0.1 * jax.random.normal(ks[1], (Cout,), jnp.float32),
        "s1": s1, "t1": t1,
        "w2": 0.2 * jax.random.normal(ks[2], (Cout, Cout, K), jnp.float32),
        "b2": 0.1 * jax.random.normal(ks[3], (Cout,), jnp.float32),
        "s2": s2, "t2": t2,
        "wd": 0.2 * jax.random.normal(ks[12], (Cout, Cin), jnp.float32),
        "bd": 0.1 * jax.random.normal(ks[13], (Cout,), jnp.float32),
    }

    x = jax.random.normal(ks[14], (N, Cin, T), jnp.float32)   # PyTorch (N, C, T)

    out = temporal_block(x, params, kernel_size=K, dilation=dil, padding=pad)
    out = jax.block_until_ready(out)

    ref = ref_forward(np.asarray(x), {k: np.asarray(v) for k, v in params.items()},
                      kernel_size=K, dilation=dil, padding=pad)
    # MXU operands (x, weights) are bf16 with f32 accumulation -> looser tolerance.
    np.testing.assert_allclose(np.asarray(out), ref, rtol=5e-2, atol=5e-2)

    # TODO(synk): BatchNorm training-mode batch statistics, Dropout masking, and
    # the PReLU / no_padding module variants are intentionally not modeled
    # (module reproduced in eval semantics with relu_type='relu', no_padding=False).
    print("KERNEL_OK")
</pallas_src>

<mosaic_0001>
module attributes {stable_mosaic.version = 11 : i64} {
  func.func @kernel(%arg0: i32, %arg1: memref<4x128xbf16, #tpu.memory_space<vmem>>, %arg2: memref<3x8x4xbf16, #tpu.memory_space<vmem>>, %arg3: memref<8x1xf32, #tpu.memory_space<vmem>>, %arg4: memref<8x4xbf16, #tpu.memory_space<vmem>>, %arg5: memref<8x1xf32, #tpu.memory_space<vmem>>, %arg6: memref<3x8x8xbf16, #tpu.memory_space<vmem>>, %arg7: memref<8x1xf32, #tpu.memory_space<vmem>>, %arg8: memref<8x128xf32, #tpu.memory_space<vmem>>) attributes {dimension_semantics = [#tpu.dimension_semantics<parallel>], iteration_bounds = array<i64: 1>, scalar_prefetch = 0 : i64, scratch_operands = 0 : i64, tpu.core_type = #tpu.core_type<tc>, window_params = [{transform_indices = @transform_0, window_bounds = array<i64: 4, 128>}, {pipeline_mode = #tpu.pipeline_mode<synchronous>, transform_indices = @transform_1, window_bounds = array<i64: 3, 8, 4>}, {pipeline_mode = #tpu.pipeline_mode<synchronous>, transform_indices = @transform_2, window_bounds = array<i64: 8, 1>}, {pipeline_mode = #tpu.pipeline_mode<synchronous>, transform_indices = @transform_3, window_bounds = array<i64: 8, 4>}, {pipeline_mode = #tpu.pipeline_mode<synchronous>, transform_indices = @transform_4, window_bounds = array<i64: 8, 1>}, {pipeline_mode = #tpu.pipeline_mode<synchronous>, transform_indices = @transform_5, window_bounds = array<i64: 3, 8, 8>}, {pipeline_mode = #tpu.pipeline_mode<synchronous>, transform_indices = @transform_6, window_bounds = array<i64: 8, 1>}, {transform_indices = @transform_7, window_bounds = array<i64: 8, 128>}]} {
    %0 = tpu.iota {dimensions = array<i32: 1>} : vector<1x128xi32>
    %c15_i32 = arith.constant 15 : i32
    %1 = vector.broadcast %c15_i32 : i32 to vector<1x128xi32>
    %2 = arith.andi %0, %1 : vector<1x128xi32>
    %c2_i32 = arith.constant 2 : i32
    %3 = vector.broadcast %c2_i32 : i32 to vector<1x128xi32>
    %4 = arith.cmpi sge, %2, %3 : vector<1x128xi32>
    %c1_i32 = arith.constant 1 : i32
    %5 = vector.broadcast %c1_i32 : i32 to vector<1x128xi32>
    %6 = arith.cmpi sge, %2, %5 : vector<1x128xi32>
    %c0 = arith.constant 0 : index
    %c0_0 = arith.constant 0 : index
    %7 = vector.load %arg1[%c0, %c0_0] : memref<4x128xbf16, #tpu.memory_space<vmem>>, vector<4x128xbf16>
    %8 = arith.extf %7 : vector<4x128xbf16> to vector<4x128xf32>
    %c2_i32_1 = arith.constant 2 : i32
    %9 = tpu.dynamic_rotate %8 by %c2_i32_1 dim 1 : vector<4x128xf32>, i32 -> vector<4x128xf32>
    %cst = arith.constant 0.000000e+00 : f32
    %10 = vector.shape_cast %4 : vector<1x128xi1> to vector<1x128xi1>
    %11 = vector.broadcast %10 : vector<1x128xi1> to vector<4x128xi1>
    %12 = vector.broadcast %cst : f32 to vector<4x128xf32>
    %13 = arith.select %11, %9, %12 : vector<4x128xi1>, vector<4x128xf32>
    %14 = arith.truncf %13 : vector<4x128xf32> to vector<4x128xbf16>
    %c0_2 = arith.constant 0 : index
    %c0_3 = arith.constant 0 : index
    %c0_4 = arith.constant 0 : index
    %15 = vector.load %arg2[%c0_2, %c0_3, %c0_4] : memref<3x8x4xbf16, #tpu.memory_space<vmem>>, vector<1x8x4xbf16>
    %16 = vector.shape_cast %15 : vector<1x8x4xbf16> to vector<8x4xbf16>
    %cst_5 = arith.constant dense<0.000000e+00> : vector<8x128xf32>
    %17 = tpu.matmul %16, %14, %cst_5 {dimension_numbers = #tpu.dot_dimension_numbers<[1], [0], [0], [1], [0, 0, 1, 1], [], []>} : vector<8x4xbf16>, vector<4x128xbf16>, vector<8x128xf32> -> vector<8x128xf32>
    %c1_i32_6 = arith.constant 1 : i32
    %18 = tpu.dynamic_rotate %8 by %c1_i32_6 dim 1 : vector<4x128xf32>, i32 -> vector<4x128xf32>
    %cst_7 = arith.constant 0.000000e+00 : f32
    %19 = vector.shape_cast %6 : vector<1x128xi1> to vector<1x128xi1>
    %20 = vector.broadcast %19 : vector<1x128xi1> to vector<4x128xi1>
    %21 = vector.broadcast %cst_7 : f32 to vector<4x128xf32>
    %22 = arith.select %20, %18, %21 : vector<4x128xi1>, vector<4x128xf32>
    %23 = arith.truncf %22 : vector<4x128xf32> to vector<4x128xbf16>
    %c1 = arith.constant 1 : index
    %c0_8 = arith.constant 0 : index
    %c0_9 = arith.constant 0 : index
    %24 = vector.load %arg2[%c1, %c0_8, %c0_9] : memref<3x8x4xbf16, #tpu.memory_space<vmem>>, vector<1x8x4xbf16>
    %25 = vector.shape_cast %24 : vector<1x8x4xbf16> to vector<8x4xbf16>
    %cst_10 = arith.constant dense<0.000000e+00> : vector<8x128xf32>
    %26 = tpu.matmul %25, %23, %cst_10 {dimension_numbers = #tpu.dot_dimension_numbers<[1], [0], [0], [1], [0, 0, 1, 1], [], []>} : vector<8x4xbf16>, vector<4x128xbf16>, vector<8x128xf32> -> vector<8x128xf32>
    %27 = arith.addf %17, %26 : vector<8x128xf32>
    %c2 = arith.constant 2 : index
    %c0_11 = arith.constant 0 : index
    %c0_12 = arith.constant 0 : index
    %28 = vector.load %arg2[%c2, %c0_11, %c0_12] : memref<3x8x4xbf16, #tpu.memory_space<vmem>>, vector<1x8x4xbf16>
    %29 = vector.shape_cast %28 : vector<1x8x4xbf16> to vector<8x4xbf16>
    %cst_13 = arith.constant dense<0.000000e+00> : vector<8x128xf32>
    %30 = tpu.matmul %29, %7, %cst_13 {dimension_numbers = #tpu.dot_dimension_numbers<[1], [0], [0], [1], [0, 0, 1, 1], [], []>} : vector<8x4xbf16>, vector<4x128xbf16>, vector<8x128xf32> -> vector<8x128xf32>
    %31 = arith.addf %27, %30 : vector<8x128xf32>
    %c0_14 = arith.constant 0 : index
    %c0_15 = arith.constant 0 : index
    %32 = vector.load %arg3[%c0_14, %c0_15] : memref<8x1xf32, #tpu.memory_space<vmem>>, vector<8x1xf32>
    %33 = vector.broadcast %32 : vector<8x1xf32> to vector<8x128xf32>
    %34 = arith.addf %31, %33 : vector<8x128xf32>
    %cst_16 = arith.constant 0.000000e+00 : f32
    %35 = vector.broadcast %cst_16 : f32 to vector<8x128xf32>
    %36 = arith.maximumf %34, %35 : vector<8x128xf32>
    %c0_17 = arith.constant 0 : index
    %c0_18 = arith.constant 0 : index
    %37 = vector.load %arg4[%c0_17, %c0_18] : memref<8x4xbf16, #tpu.memory_space<vmem>>, vector<8x4xbf16>
    %cst_19 = arith.constant dense<0.000000e+00> : vector<8x128xf32>
    %38 = tpu.matmul %37, %7, %cst_19 {dimension_numbers = #tpu.dot_dimension_numbers<[1], [0], [0], [1], [0, 0, 1, 1], [], []>} : vector<8x4xbf16>, vector<4x128xbf16>, vector<8x128xf32> -> vector<8x128xf32>
    %c0_20 = arith.constant 0 : index
    %c0_21 = arith.constant 0 : index
    %39 = vector.load %arg5[%c0_20, %c0_21] : memref<8x1xf32, #tpu.memory_space<vmem>>, vector<8x1xf32>
    %40 = vector.broadcast %39 : vector<8x1xf32> to vector<8x128xf32>
    %41 = arith.addf %38, %40 : vector<8x128xf32>
    %42 = arith.truncf %36 : vector<8x128xf32> to vector<8x128xbf16>
    %c2_i32_22 = arith.constant 2 : i32
    %43 = tpu.dynamic_rotate %36 by %c2_i32_22 dim 1 : vector<8x128xf32>, i32 -> vector<8x128xf32>
    %cst_23 = arith.constant 0.000000e+00 : f32
    %44 = vector.shape_cast %4 : vector<1x128xi1> to vector<1x128xi1>
    %45 = vector.broadcast %44 : vector<1x128xi1> to vector<8x128xi1>
    %46 = vector.broadcast %cst_23 : f32 to vector<8x128xf32>
    %47 = arith.select %45, %43, %46 : vector<8x128xi1>, vector<8x128xf32>
    %48 = arith.truncf %47 : vector<8x128xf32> to vector<8x128xbf16>
    %c0_24 = arith.constant 0 : index
    %c0_25 = arith.constant 0 : index
    %c0_26 = arith.constant 0 : index
    %49 = vector.load %arg6[%c0_24, %c0_25, %c0_26] : memref<3x8x8xbf16, #tpu.memory_space<vmem>>, vector<1x8x8xbf16>
    %50 = vector.shape_cast %49 : vector<1x8x8xbf16> to vector<8x8xbf16>
    %cst_27 = arith.constant dense<0.000000e+00> : vector<8x128xf32>
    %51 = tpu.matmul %50, %48, %cst_27 {dimension_numbers = #tpu.dot_dimension_numbers<[1], [0], [0], [1], [0, 0, 1, 1], [], []>} : vector<8x8xbf16>, vector<8x128xbf16>, vector<8x128xf32> -> vector<8x128xf32>
    %c1_i32_28 = arith.constant 1 : i32
    %52 = tpu.dynamic_rotate %36 by %c1_i32_28 dim 1 : vector<8x128xf32>, i32 -> vector<8x128xf32>
    %cst_29 = arith.constant 0.000000e+00 : f32
    %53 = vector.shape_cast %6 : vector<1x128xi1> to vector<1x128xi1>
    %54 = vector.broadcast %53 : vector<1x128xi1> to vector<8x128xi1>
    %55 = vector.broadcast %cst_29 : f32 to vector<8x128xf32>
    %56 = arith.select %54, %52, %55 : vector<8x128xi1>, vector<8x128xf32>
    %57 = arith.truncf %56 : vector<8x128xf32> to vector<8x128xbf16>
    %c1_30 = arith.constant 1 : index
    %c0_31 = arith.constant 0 : index
    %c0_32 = arith.constant 0 : index
    %58 = vector.load %arg6[%c1_30, %c0_31, %c0_32] : memref<3x8x8xbf16, #tpu.memory_space<vmem>>, vector<1x8x8xbf16>
    %59 = vector.shape_cast %58 : vector<1x8x8xbf16> to vector<8x8xbf16>
    %cst_33 = arith.constant dense<0.000000e+00> : vector<8x128xf32>
    %60 = tpu.matmul %59, %57, %cst_33 {dimension_numbers = #tpu.dot_dimension_numbers<[1], [0], [0], [1], [0, 0, 1, 1], [], []>} : vector<8x8xbf16>, vector<8x128xbf16>, vector<8x128xf32> -> vector<8x128xf32>
    %61 = arith.addf %51, %60 : vector<8x128xf32>
    %c2_34 = arith.constant 2 : index
    %c0_35 = arith.constant 0 : index
    %c0_36 = arith.constant 0 : index
    %62 = vector.load %arg6[%c2_34, %c0_35, %c0_36] : memref<3x8x8xbf16, #tpu.memory_space<vmem>>, vector<1x8x8xbf16>
    %63 = vector.shape_cast %62 : vector<1x8x8xbf16> to vector<8x8xbf16>
    %cst_37 = arith.constant dense<0.000000e+00> : vector<8x128xf32>
    %64 = tpu.matmul %63, %42, %cst_37 {dimension_numbers = #tpu.dot_dimension_numbers<[1], [0], [0], [1], [0, 0, 1, 1], [], []>} : vector<8x8xbf16>, vector<8x128xbf16>, vector<8x128xf32> -> vector<8x128xf32>
    %65 = arith.addf %61, %64 : vector<8x128xf32>
    %c0_38 = arith.constant 0 : index
    %c0_39 = arith.constant 0 : index
    %66 = vector.load %arg7[%c0_38, %c0_39] : memref<8x1xf32, #tpu.memory_space<vmem>>, vector<8x1xf32>
    %67 = vector.broadcast %66 : vector<8x1xf32> to vector<8x128xf32>
    %68 = arith.addf %65, %67 : vector<8x128xf32>
    %cst_40 = arith.constant 0.000000e+00 : f32
    %69 = vector.broadcast %cst_40 : f32 to vector<8x128xf32>
    %70 = arith.maximumf %68, %69 : vector<8x128xf32>
    %71 = arith.addf %70, %41 : vector<8x128xf32>
    %cst_41 = arith.constant 0.000000e+00 : f32
    %72 = vector.broadcast %cst_41 : f32 to vector<8x128xf32>
    %73 = arith.maximumf %71, %72 : vector<8x128xf32>
    %c0_42 = arith.constant 0 : index
    %c0_43 = arith.constant 0 : index
    %74 = vector.load %arg8[%c0_42, %c0_43] : memref<8x128xf32, #tpu.memory_space<vmem>>, vector<8x128xf32>
    tpu.vector_store %arg8[%c0_42, %c0_43], %73 {strides = array<i32>} : memref<8x128xf32, #tpu.memory_space<vmem>>, vector<8x128xf32>,
    return
  }
  func.func @transform_0(%arg0: i32) -> (i32, i32) {
    %c0_i32 = arith.constant 0 : i32
    %c0_i32_0 = arith.constant 0 : i32
    return %c0_i32, %arg0 : i32, i32
  }
  func.func @transform_1(%arg0: i32) -> (i32, i32, i32) {
    %c0_i32 = arith.constant 0 : i32
    %c0_i32_0 = arith.constant 0 : i32
    %c0_i32_1 = arith.constant 0 : i32
    %c0_i32_2 = arith.constant 0 : i32
    return %c0_i32, %c0_i32_0, %c0_i32_1 : i32, i32, i32
  }
  func.func @transform_2(%arg0: i32) -> (i32, i32) {
    %c0_i32 = arith.constant 0 : i32
    %c0_i32_0 = arith.constant 0 : i32
    %c0_i32_1 = arith.constant 0 : i32
    return %c0_i32, %c0_i32_0 : i32, i32
  }
  func.func @transform_3(%arg0: i32) -> (i32, i32) {
    %c0_i32 = arith.constant 0 : i32
    %c0_i32_0 = arith.constant 0 : i32
    %c0_i32_1 = arith.constant 0 : i32
    return %c0_i32, %c0_i32_0 : i32, i32
  }
  func.func @transform_4(%arg0: i32) -> (i32, i32) {
    %c0_i32 = arith.constant 0 : i32
    %c0_i32_0 = arith.constant 0 : i32
    %c0_i32_1 = arith.constant 0 : i32
    return %c0_i32, %c0_i32_0 : i32, i32
  }
  func.func @transform_5(%arg0: i32) -> (i32, i32, i32) {
    %c0_i32 = arith.constant 0 : i32
    %c0_i32_0 = arith.constant 0 : i32
    %c0_i32_1 = arith.constant 0 : i32
    %c0_i32_2 = arith.constant 0 : i32
    return %c0_i32, %c0_i32_0, %c0_i32_1 : i32, i32, i32
  }
  func.func @transform_6(%arg0: i32) -> (i32, i32) {
    %c0_i32 = arith.constant 0 : i32
    %c0_i32_0 = arith.constant 0 : i32
    %c0_i32_1 = arith.constant 0 : i32
    return %c0_i32, %c0_i32_0 : i32, i32
  }
  func.func @transform_7(%arg0: i32) -> (i32, i32) {
    %c0_i32 = arith.constant 0 : i32
    %c0_i32_0 = arith.constant 0 : i32
    return %c0_i32, %arg0 : i32, i32
  }
}

</mosaic_0001>

<bundles_post_ra>
// kernel: temporal_block.1
= control target key start
LH: loop header
LB: loop body
LE: loop exit
PB: predicated region body
PF: predicated region fallthrough
CT: control target
= control target key end

     0   :  { %v494_v1 = vmov 0.0   ;;  %vm495_vm0 = vmmov 0   ;;  %s496_s26 = smov 1   ;;  %v497_v3 = vmov 0   ;;  %s498_s28 = smov 2   ;;  %v27_v5 = vlaneseq  ;;  %s620_s0 = inlined_call_operand.vmem [shape: bf16[4,128], index: 0, kind: input, shape index: {}]   ;;  %s621_s2 = inlined_call_operand.vmem [shape: f32[8,1], index: 2, kind: input, shape index: {}]   ;;  %s622_s1 = inlined_call_operand.vmem [shape: bf16[3,8,4], index: 1, kind: input, shape index: {}]   ;;  %s623_s3 = inlined_call_operand.vmem [shape: bf16[8,4], index: 3, kind: input, shape index: {}]   ;;  %s624_s6 = inlined_call_operand.vmem [shape: f32[8,1], index: 6, kind: input, shape index: {}]   ;;  %s625_s4 = inlined_call_operand.vmem [shape: f32[8,1], index: 4, kind: input, shape index: {}]   ;;  %s626_s5 = inlined_call_operand.vmem [shape: bf16[3,8,8], index: 5, kind: input, shape index: {}]   ;;  %s627_s7 = inlined_call_operand.vmem [shape: f32[8,128], index: 7, kind: output, shape index: {}]  }
   0x1   :  { %v32_v0 = vld [vmem:[%s620_s0] sm:$0x3]  ;;  %445 = vmatprep.subr.bf16.mxu0 %v494_v1  ;;  %447 = vmatprep.mubr.msk.bf16.mxu0 %vm495_vm0, %v494_v1  ;;  %vm53_vm2 = vcmask 1041408   ;;  %v420_v16 = vld [vmem:[%s622_s1 + $0x4] sm:$0xf]  ;;  %vm49_vm4 = vcmask 31744  }
   0x2   :  { %v33_v2 = vunpack.c.l.bf16 %v32_v0  ;;  %451 = vmatprep.subr.bf16.mxu1 %v494_v1  ;;  %453 = vmatprep.mubr.msk.bf16.mxu1 %vm495_vm0, %v494_v1  ;;  %v192_v4 = vld [vmem:[%s621_s2] sm:$0xff]  ;;  %v28_v6 = vand.u32 127, %v27_v5  ;;  %v149_v18 = vsel %vm53_vm2, %v32_v0, 0  ;;  %v423_v21 = vld [vmem:[%s622_s1 + $0x8] sm:$0xf]  ;;  %vm266_vm5 = vcmask 1043456  }
   0x3   :  { %492 = vset.pattern.permute.xlu1 %v497_v3  ;;  %493 = vset.pattern.permute.xlu0 %v497_v3  ;;  %v40_v20 = vld [vmem:[%s622_s1] sm:$0xf]  ;;  %v426_v51 = vld [vmem:[%s626_s5 + $0x4] sm:$0xf]  ;;  %vm262_vm6 = vcmask 64512  }
   0x4   :  { %41 = vrot.lane.b32.xlu0 %v33_v2, %s496_s26  ;;  %195 = vperm.xlu1 %492, %v192_v4   ;;  %v29_v7 = vand.u32 15, %v28_v6  ;;  %v200_v23 = vld [vmem:[%s623_s3] sm:$0xf]  ;;  %v429_v54 = vld [vmem:[%s626_s5 + $0x8] sm:$0xf] }
   0x5   :  { %v405_v40 = vld [vmem:[%s624_s6] sm:$0xff] }
   0x6   :  { %vm553_vm1 = vcmp.ge.s32.totalorder %v29_v7, 1  ;;  %vm559_vm3 = vcmp.ge.s32.totalorder %v29_v7, 2  ;;  %v201_v41 = vld [vmem:[%s625_s4] sm:$0xff] }
   0x7   :  { %v255_v52 = vld [vmem:[%s626_s5] sm:$0xf] }
   0x8   :  { %34 = vrot.lane.b32.xlu0 %v33_v2, %s498_s28 }
  0x76   :  { %v42_v9 = vpop.permute.xlu0 %41 }
  0x77   :  { %v45_v10 = vsel %vm553_vm1, %v42_v9, 0.0 }
  0x78   :  { %v46_v11 = vpack.c.bf16 %v45_v10, %v45_v10 }
  0x7a   :  { %v35_v13 = vpop.permute.xlu0 %34  ;;  %v55_v14 = vsel %vm53_vm2, %v46_v11, 0 }
  0x7b   :  { %v38_v15 = vsel %vm559_vm3, %v35_v13, 0.0  ;;  %446 = vmatpush3.bf16.msra.mxu0 %v55_v14 }
  0x7c   :  { %v39_v17 = vpack.c.bf16 %v38_v15, %v38_v15  ;;  %457 = vmatprep.subr.bf16.mxu0 %v494_v1 }
  0x7e   :  { %448 = vmatmul.mubr.msk.bf16.vlgmr.msra.gmra.mrb[0].mxu0 %vm49_vm4, %v420_v16  ;;  %v101_v19 = vsel %vm53_vm2, %v39_v17, 0 }
  0x7f   :  { %452 = vmatpush3.bf16.msra.mxu1 %v101_v19  ;;  %458 = vmatpush3.bf16.msra.mxu0 %v149_v18 }
  0x80   :  { %459 = vmatprep.mubr.msk.bf16.mxu0 %vm495_vm0, %v494_v1  ;;  %463 = vmatprep.subr.bf16.mxu1 %v494_v1 }
  0x81   :  { %469 = vmatprep.subr.bf16.mxu0 %v494_v1 }
  0x82   :  { %454 = vmatmul.mubr.msk.bf16.vlgmr.msra.gmra.mrb[0].mxu1 %vm49_vm4, %v40_v20 }
  0x83   :  { %464 = vmatpush3.bf16.msra.mxu1 %v149_v18  ;;  %465 = vmatprep.mubr.msk.bf16.mxu1 %vm495_vm0, %v494_v1  ;;  %v196_v33 = vpop.permute.xlu1 %195 }
  0x84   :  { %475 = vmatprep.subr.bf16.mxu1 %v494_v1 }
  0x86   :  { %460 = vmatmul.mubr.msk.bf16.vlgmr.msra.gmra.mrb[4].mxu0 %vm49_vm4, %v423_v21 }
  0x87   :  { %471 = vmatprep.mubr.msk.bf16.mxu0 %vm495_vm0, %v494_v1 }
  0x8a   :  { %466 = vmatmul.mubr.msk.bf16.vlgmr.msra.gmra.mrb[4].mxu1 %vm49_vm4, %v200_v23 }
  0x8b   :  { %477 = vmatprep.mubr.msk.bf16.mxu1 %vm495_vm0, %v494_v1 }
 0x151   :  { %v91_v22 = vpop.f32.mrb[0].mxu0 }
 0x152   :  { %v449_v24 = vpop.f32.mrb[1].mxu0 }
 0x153   :  { %v94_v25 = vpop.f32.mrb[2].mxu0 }
 0x154   :  { %v450_v26 = vpop.f32.mrb[3].mxu0 }
 0x155   :  { %v137_v27 = vpop.f32.mrb[0].mxu1 }
 0x156   :  { %v138_v28 = vadd.f32 %v137_v27, %v91_v22  ;;  %v455_v29 = vpop.f32.mrb[1].mxu1 }
 0x157   :  { %v140_v30 = vpop.f32.mrb[2].mxu1 }
 0x158   :  { %v456_v31 = vpop.f32.mrb[3].mxu1 }
 0x159   :  { %v185_v32 = vpop.f32.mrb[4].mxu0 }
 0x15a   :  { %v191_v34 = vadd.f32 %v185_v32, %v138_v28  ;;  %v461_v35 = vpop.f32.mrb[5].mxu0 }
 0x15b   :  { %v188_v36 = vpop.f32.mrb[6].mxu0 }
 0x15c   :  { %v198_v37 = vadd.f32 %v196_v33, %v191_v34  ;;  %v462_v38 = vpop.f32.mrb[7].mxu0 }
 0x15d   :  { %v244_v55 = vpop.f32.mrb[4].mxu1 }
 0x15e   :  { %v199_v39 = vmax.f32 %v198_v37, 0.0  ;;  %v467_v56 = vpop.f32.mrb[5].mxu1 }
 0x15f   :  { %v247_v57 = vpop.f32.mrb[6].mxu1 }
 0x160   :  { %251 = vrot.lane.b32.xlu0 %v199_v39, %s498_s28  ;;  %256 = vrot.lane.b32.xlu1 %v199_v39, %s496_s26  ;;  %v250_v50 = vpack.c.bf16 %v199_v39, %v199_v39  ;;  %v468_v58 = vpop.f32.mrb[7].mxu1 }
 0x162   :  { %v362_v53 = vsel %vm266_vm5, %v250_v50, 0 }
 0x164   :  { %408 = vperm.xlu1 %492, %v405_v40   ;;  %204 = vperm.xlu0 %493, %v201_v41  }
 0x1d2   :  { %v252_v42 = vpop.permute.xlu0 %251  ;;  %v257_v43 = vpop.permute.xlu1 %256 }
 0x1d3   :  { %v253_v44 = vsel %vm559_vm3, %v252_v42, 0.0  ;;  %v258_v45 = vsel %vm553_vm1, %v257_v43, 0.0 }
 0x1d4   :  { %v254_v46 = vpack.c.bf16 %v253_v44, %v253_v44  ;;  %v259_v47 = vpack.c.bf16 %v258_v45, %v258_v45 }
 0x1d6   :  { %v314_v48 = vsel %vm266_vm5, %v254_v46, 0  ;;  %v268_v49 = vsel %vm266_vm5, %v259_v47, 0 }
 0x1d7   :  { %470 = vmatpush3.bf16.msra.mxu0 %v268_v49  ;;  %476 = vmatpush3.bf16.msra.mxu1 %v314_v48 }
 0x1d8   :  { %481 = vmatprep.subr.bf16.mxu0 %v494_v1 }
 0x1da   :  { %472 = vmatmul.mubr.msk.bf16.vlgmr.msra.gmra.mrb[8].mxu0 %vm262_vm6, %v426_v51  ;;  %478 = vmatmul.mubr.msk.bf16.vlgmr.msra.gmra.mrb[8].mxu1 %vm262_vm6, %v255_v52 }
 0x1db   :  { %482 = vmatpush3.bf16.msra.mxu0 %v362_v53  ;;  %483 = vmatprep.mubr.msk.bf16.mxu0 %vm495_vm0, %v494_v1 }
 0x1e2   :  { %484 = vmatmul.mubr.msk.bf16.vlgmr.msra.gmra.mrb[12].mxu0 %vm262_vm6, %v429_v54 }
 0x1e3   :  { %v409_v1 = vpop.permute.xlu1 %408  ;;  %v205_v8 = vpop.permute.xlu0 %204 }
 0x1e4   :  { %v245_v12 = vadd.f32 %v244_v55, %v205_v8 }
 0x2ad   :  { %v304_v59 = vpop.f32.mrb[8].mxu0  ;;  %v350_v60 = vpop.f32.mrb[8].mxu1 }
 0x2ae   :  { %v473_v61 = vpop.f32.mrb[9].mxu0  ;;  %v351_v62 = vadd.f32 %v350_v60, %v304_v59  ;;  %v479_v63 = vpop.f32.mrb[9].mxu1 }
 0x2af   :  { %v307_v0 = vpop.f32.mrb[10].mxu0  ;;  %v353_v2 = vpop.f32.mrb[10].mxu1 }
 0x2b0   :  { %v474_v3 = vpop.f32.mrb[11].mxu0  ;;  %v480_v4 = vpop.f32.mrb[11].mxu1 }
 0x2b5   :  { %v398_v5 = vpop.f32.mrb[12].mxu0 }
 0x2b6   :  { %v404_v6 = vadd.f32 %v398_v5, %v351_v62  ;;  %v485_v7 = vpop.f32.mrb[13].mxu0 }
 0x2b7   :  { %v401_v9 = vpop.f32.mrb[14].mxu0 }
 0x2b8   :  { %v411_v10 = vadd.f32 %v409_v1, %v404_v6  ;;  %v486_v11 = vpop.f32.mrb[15].mxu0 }
 0x2ba   :  { %v412_v13 = vmax.f32 %v411_v10, 0.0 }
 0x2bc   :  { %v413_v14 = vadd.f32 %v412_v13, %v245_v12 }
 0x2be   :  { %v414_v15 = vmax.f32 %v413_v14, 0.0 }
 0x2c0   :  { %415 = vst [vmem:[%s627_s7] sm:$0xff] %v414_v15 }

</bundles_post_ra>
